<compile_context>
chip_gen: v5e
topology: v5e:2x2
jax: 0.10.0
libtpu: 0.0.40
codegen_flags: <defaults>
</compile_context>

<pallas_src>
import functools

import jax
import jax.numpy as jnp
from jax.experimental import pallas as pl
from jax.experimental.pallas import tpu as pltpu


def _round_up(x, m):
    return ((x + m - 1) // m) * m


def _cdiv(a, b):
    return (a + b - 1) // b


def _mlp_head_kernel(x_ref, w1_ref, b1_ref, w2_ref, b2_ref, o_ref):
    # First linear: (tm, C) @ (C, Hp) with f32 accumulation on the MXU.
    h = jnp.dot(x_ref[...], w1_ref[...], preferred_element_type=jnp.float32)
    h = jnp.maximum(h + b1_ref[...], 0.0)                     # bias + ReLU (f32, VPU)
    # Second linear: (tm, Hp) @ (Hp, L). Cast activations to the weight dtype
    # so a bf16-weight deployment also runs the MXU at the low-precision rate.
    y = jnp.dot(h.astype(w2_ref.dtype), w2_ref[...],
                preferred_element_type=jnp.float32)
    y = jnp.maximum(y + b2_ref[...], 0.0)                     # relu_final=True
    o_ref[...] = jax.nn.sigmoid(y).astype(o_ref.dtype)        # torch.sigmoid


def multilabel_classification_head_forward(x, w1, b1, w2, b2, *,
                                            tm=512,
                                            compute_dtype=None,
                                            x_buffer_count=2,
                                            single_buffer_weights=False):
    """Forward pass of MultilabelClassificationHead.

    Args:
      x:  [N, in_channels]
      w1: [in_channels, hidden]      (pre-transposed vs. nn.Linear)
      b1: [1, hidden] or [hidden]
      w2: [hidden, num_labels]
      b2: [1, num_labels] or [num_labels]
      tm: target batch tile (rows per grid step); clamped automatically by the
          batch size, the VMEM budget, and a ">=2 grid steps" megacore rule.
      compute_dtype: e.g. jnp.bfloat16 to halve *weight* HBM bytes on v6e/v7x.
          x is NOT cast (that would add an extra HBM pass over x); MXU
          accumulation, bias, ReLU and sigmoid stay f32.
      x_buffer_count: pipeline depth for the x tile (3 can help on v5e).
      single_buffer_weights: use pl.Buffered(1) on the grid-invariant
          weights/biases to halve their VMEM footprint (useful for large C*H).

    Returns: [N, num_labels] with x's original dtype.
    """
    N, C = x.shape
    Cw, H = w1.shape
    Hw, L = w2.shape
    assert C == Cw and H == Hw, "weight shapes inconsistent with input"

    out_dtype = x.dtype

    # Low-precision path applies to weights only (x stays in its own dtype —
    # see module docstring). Mixed-dtype dots accumulate in f32 regardless.
    if compute_dtype is not None:
        w1 = w1.astype(compute_dtype)
        w2 = w2.astype(compute_dtype)

    # Lane-align the hidden dim; zeros are matmul/ReLU neutral.  The tiny label
    # dim L stays unpadded so the kernel writes only N*L output bytes.
    Hp = _round_up(H, 128)
    if Hp != H:
        w1 = jnp.pad(w1, ((0, 0), (0, Hp - H)))
        w2 = jnp.pad(w2, ((0, Hp - H), (0, 0)))
    b1p = jnp.pad(b1.reshape(1, H).astype(jnp.float32), ((0, 0), (0, Hp - H)))
    b2p = b2.reshape(1, L).astype(jnp.float32)

    x_itemsize = jnp.dtype(x.dtype).itemsize
    w_itemsize = jnp.dtype(w1.dtype).itemsize
    out_itemsize = jnp.dtype(out_dtype).itemsize

    # VMEM cap: ~3/4 of physical per-core VMEM (v7x: 48/64 MiB, v5e/v6e:
    # 96/128 MiB).  Fallback is v7x-safe.
    try:
        vmem_cap = int(pltpu.get_tpu_info().vmem_capacity_bytes) * 3 // 4
    except Exception:
        vmem_cap = 48 << 20

    # Weight/bias VMEM footprint.  Default pipelining double-buffers every
    # operand — even grid-invariant ones — so count 2x unless single-buffered.
    wbuf = 1 if single_buffer_weights else 2
    weight_bytes = wbuf * (C * Hp * w_itemsize + Hp * 4
                           + Hp * L * w_itemsize + L * 4)
    # Per-batch-row VMEM: pipelined x tile + double-buffered output tile
    # + the f32 hidden activation.
    per_row_bytes = (x_buffer_count * C * x_itemsize
                     + 2 * L * out_itemsize
                     + Hp * 4)
    headroom = 8 << 20

    # --- Batch tiling: no padding of x; rely on ragged last block handling.
    if N <= 8:
        tm = N                                   # single tile, full-dim exemption
    else:
        tm = _round_up(max(8, int(tm)), 8)
        tm = min(tm, (N // 8) * 8)               # block never exceeds the array
        if N >= 16:
            # Keep >=2 (ideally ~4) grid steps so both v7x TensorCores get work
            # and DMA/compute overlap exists.
            tm = min(tm, max(8, _round_up(_cdiv(N, 4), 8)))
        # Respect the VMEM budget.
        tm_vmem = (max(vmem_cap - weight_bytes - headroom, 0)
                   // max(per_row_bytes, 1)) // 8 * 8
        tm = max(8, min(tm, max(tm_vmem, 8)))
    grid = (_cdiv(N, tm),)

    vmem_need = weight_bytes + tm * per_row_bytes
    vmem_limit = int(min(vmem_cap, max(32 << 20, vmem_need + headroom)))

    # Advisory cost estimate (sigmoid ~ exp + reciprocal per element).
    cost = pl.CostEstimate(
        flops=int(2 * N * C * Hp + 2 * N * Hp * L),
        transcendentals=int(2 * N * L),
        bytes_accessed=int(x_itemsize * N * C
                           + w_itemsize * (C * Hp + Hp * L)
                           + 4 * (Hp + L)
                           + out_itemsize * N * L),
    )

    x_spec_kwargs = {}
    if x_buffer_count != 2:
        x_spec_kwargs["pipeline_mode"] = pl.Buffered(int(x_buffer_count))
    w_spec_kwargs = {}
    if single_buffer_weights:
        w_spec_kwargs["pipeline_mode"] = pl.Buffered(1)

    out = pl.pallas_call(
        _mlp_head_kernel,
        out_shape=jax.ShapeDtypeStruct((N, L), out_dtype),
        grid_spec=pltpu.PrefetchScalarGridSpec(
            num_scalar_prefetch=0,
            grid=grid,
            in_specs=[
                pl.BlockSpec((tm, C), lambda i: (i, 0), **x_spec_kwargs),   # x tile
                pl.BlockSpec((C, Hp), lambda i: (0, 0), **w_spec_kwargs),   # W1 (resident)
                pl.BlockSpec((1, Hp), lambda i: (0, 0), **w_spec_kwargs),   # b1
                pl.BlockSpec((Hp, L), lambda i: (0, 0), **w_spec_kwargs),   # W2 (resident)
                pl.BlockSpec((1, L), lambda i: (0, 0), **w_spec_kwargs),    # b2
            ],
            out_specs=pl.BlockSpec((tm, L), lambda i: (i, 0)),              # [N, L] direct
        ),
        compiler_params=pltpu.CompilerParams(
            dimension_semantics=("parallel",),   # megacore-shardable batch axis
            vmem_limit_bytes=vmem_limit,
        ),
        cost_estimate=cost,
    )(x, w1, b1p, w2, b2p)

    return out


def init_params(key, in_channels, hidden_dims, num_labels, dtype=jnp.float32):
    """Mirrors init_weights(): normal(mean=0, std=0.01) weights, zero bias."""
    feature_dims = [in_channels] + list(hidden_dims) + [num_labels]
    params = []
    for i in range(len(feature_dims) - 1):
        key, wkey = jax.random.split(key)
        fan_in, fan_out = feature_dims[i], feature_dims[i + 1]
        # stored as [in, out] (transposed relative to nn.Linear's [out, in])
        w = 0.01 * jax.random.normal(wkey, (fan_in, fan_out), dtype=dtype)
        b = jnp.zeros((1, fan_out), dtype=dtype)
        params.append((w, b))
    return params


def _reference(x, w1, b1, w2, b2):
    h = jnp.maximum(x @ w1 + b1, 0.0)
    y = jnp.maximum(h @ w2 + b2, 0.0)
    return jax.nn.sigmoid(y)


if __name__ == "__main__":
    # Small synthetic shapes consistent with the module:
    # in_channels=64, hidden_dims=(32,), num_labels=2.
    C, H, L = 64, 32, 2

    key = jax.random.PRNGKey(0)
    key, k1, k2 = jax.random.split(key, 3)
    (w1, b1), (w2, b2) = init_params(key, C, (H,), L)

    fwd = functools.partial(multilabel_classification_head_forward, tm=512)

    # Case 1: tiny ragged batch (N=6) -> single full-dim tile, no padding.
    x_small = jax.random.normal(k1, (6, C), dtype=jnp.float32)
    out_small = jax.block_until_ready(fwd(x_small, w1, b1, w2, b2))
    assert out_small.shape == (6, L)
    assert jnp.allclose(out_small, _reference(x_small, w1, b1, w2, b2),
                        atol=1e-5, rtol=1e-5)

    # Case 2: multi-step grid with a ragged last block (N=40, tm=16 -> 3 steps).
    x_big = jax.random.normal(k2, (40, C), dtype=jnp.float32)
    out_big = jax.block_until_ready(fwd(x_big, w1, b1, w2, b2))
    assert out_big.shape == (40, L)
    assert jnp.allclose(out_big, _reference(x_big, w1, b1, w2, b2),
                        atol=1e-5, rtol=1e-5)

    print("KERNEL_OK")
</pallas_src>

<mosaic_0001>
module attributes {stable_mosaic.version = 11 : i64} {
  func.func @_mlp_head_kernel(%arg0: i32, %arg1: memref<6x64xf32, #tpu.memory_space<vmem>>, %arg2: memref<64x128xf32, #tpu.memory_space<vmem>>, %arg3: memref<1x128xf32, #tpu.memory_space<vmem>>, %arg4: memref<128x2xf32, #tpu.memory_space<vmem>>, %arg5: memref<1x2xf32, #tpu.memory_space<vmem>>, %arg6: memref<6x2xf32, #tpu.memory_space<vmem>>) attributes {dimension_semantics = [#tpu.dimension_semantics<parallel>], iteration_bounds = array<i64: 1>, scalar_prefetch = 0 : i64, scratch_operands = 0 : i64, tpu.core_type = #tpu.core_type<tc>, window_params = [{transform_indices = @transform_0, window_bounds = array<i64: 6, 64>}, {pipeline_mode = #tpu.pipeline_mode<synchronous>, transform_indices = @transform_1, window_bounds = array<i64: 64, 128>}, {pipeline_mode = #tpu.pipeline_mode<synchronous>, transform_indices = @transform_2, window_bounds = array<i64: 1, 128>}, {pipeline_mode = #tpu.pipeline_mode<synchronous>, transform_indices = @transform_3, window_bounds = array<i64: 128, 2>}, {pipeline_mode = #tpu.pipeline_mode<synchronous>, transform_indices = @transform_4, window_bounds = array<i64: 1, 2>}, {transform_indices = @transform_5, window_bounds = array<i64: 6, 2>}]} {
    %c0 = arith.constant 0 : index
    %c0_0 = arith.constant 0 : index
    %0 = vector.load %arg1[%c0, %c0_0] : memref<6x64xf32, #tpu.memory_space<vmem>>, vector<6x64xf32>
    %c0_1 = arith.constant 0 : index
    %c0_2 = arith.constant 0 : index
    %1 = vector.load %arg2[%c0_1, %c0_2] : memref<64x128xf32, #tpu.memory_space<vmem>>, vector<64x128xf32>
    %cst = arith.constant dense<0.000000e+00> : vector<6x128xf32>
    %2 = tpu.matmul %0, %1, %cst {dimension_numbers = #tpu.dot_dimension_numbers<[1], [0], [0], [1], [0, 0, 1, 1], [], []>} : vector<6x64xf32>, vector<64x128xf32>, vector<6x128xf32> -> vector<6x128xf32>
    %c0_3 = arith.constant 0 : index
    %c0_4 = arith.constant 0 : index
    %3 = vector.load %arg3[%c0_3, %c0_4] : memref<1x128xf32, #tpu.memory_space<vmem>>, vector<1x128xf32>
    %4 = vector.broadcast %3 : vector<1x128xf32> to vector<6x128xf32>
    %5 = arith.addf %2, %4 : vector<6x128xf32>
    %cst_5 = arith.constant 0.000000e+00 : f32
    %6 = vector.broadcast %cst_5 : f32 to vector<6x128xf32>
    %7 = arith.maximumf %5, %6 : vector<6x128xf32>
    %c0_6 = arith.constant 0 : index
    %c0_7 = arith.constant 0 : index
    %8 = vector.load %arg4[%c0_6, %c0_7] : memref<128x2xf32, #tpu.memory_space<vmem>>, vector<128x2xf32>
    %cst_8 = arith.constant dense<0.000000e+00> : vector<6x2xf32>
    %9 = tpu.matmul %7, %8, %cst_8 {dimension_numbers = #tpu.dot_dimension_numbers<[1], [0], [0], [1], [0, 0, 1, 1], [], []>} : vector<6x128xf32>, vector<128x2xf32>, vector<6x2xf32> -> vector<6x2xf32>
    %c0_9 = arith.constant 0 : index
    %c0_10 = arith.constant 0 : index
    %10 = vector.load %arg5[%c0_9, %c0_10] : memref<1x2xf32, #tpu.memory_space<vmem>>, vector<1x2xf32>
    %11 = vector.broadcast %10 : vector<1x2xf32> to vector<6x2xf32>
    %12 = arith.addf %9, %11 : vector<6x2xf32>
    %cst_11 = arith.constant 0.000000e+00 : f32
    %13 = vector.broadcast %cst_11 : f32 to vector<6x2xf32>
    %14 = arith.maximumf %12, %13 : vector<6x2xf32>
    %15 = arith.negf %14 : vector<6x2xf32>
    %16 = math.exp %15 : vector<6x2xf32>
    %cst_12 = arith.constant 1.000000e+00 : f32
    %17 = vector.broadcast %cst_12 : f32 to vector<6x2xf32>
    %18 = arith.addf %17, %16 : vector<6x2xf32>
    %19 = arith.divf %17, %18 : vector<6x2xf32>
    %c0_13 = arith.constant 0 : index
    %c0_14 = arith.constant 0 : index
    %20 = vector.load %arg6[%c0_13, %c0_14] : memref<6x2xf32, #tpu.memory_space<vmem>>, vector<6x2xf32>
    tpu.vector_store %arg6[%c0_13, %c0_14], %19 {strides = array<i32>} : memref<6x2xf32, #tpu.memory_space<vmem>>, vector<6x2xf32>,
    return
  }
  func.func @transform_0(%arg0: i32) -> (i32, i32) {
    %c0_i32 = arith.constant 0 : i32
    %c0_i32_0 = arith.constant 0 : i32
    return %arg0, %c0_i32 : i32, i32
  }
  func.func @transform_1(%arg0: i32) -> (i32, i32) {
    %c0_i32 = arith.constant 0 : i32
    %c0_i32_0 = arith.constant 0 : i32
    %c0_i32_1 = arith.constant 0 : i32
    return %c0_i32, %c0_i32_0 : i32, i32
  }
  func.func @transform_2(%arg0: i32) -> (i32, i32) {
    %c0_i32 = arith.constant 0 : i32
    %c0_i32_0 = arith.constant 0 : i32
    %c0_i32_1 = arith.constant 0 : i32
    return %c0_i32, %c0_i32_0 : i32, i32
  }
  func.func @transform_3(%arg0: i32) -> (i32, i32) {
    %c0_i32 = arith.constant 0 : i32
    %c0_i32_0 = arith.constant 0 : i32
    %c0_i32_1 = arith.constant 0 : i32
    return %c0_i32, %c0_i32_0 : i32, i32
  }
  func.func @transform_4(%arg0: i32) -> (i32, i32) {
    %c0_i32 = arith.constant 0 : i32
    %c0_i32_0 = arith.constant 0 : i32
    %c0_i32_1 = arith.constant 0 : i32
    return %c0_i32, %c0_i32_0 : i32, i32
  }
  func.func @transform_5(%arg0: i32) -> (i32, i32) {
    %c0_i32 = arith.constant 0 : i32
    %c0_i32_0 = arith.constant 0 : i32
    return %arg0, %c0_i32 : i32, i32
  }
}

</mosaic_0001>

<bundles_post_ra>
// kernel: tpu_custom_call.1
= control target key start
LH: loop header
LB: loop body
LE: loop exit
PB: predicated region body
PF: predicated region fallthrough
CT: control target
= control target key end

     0   :  { %vm33_vm0 = vcmask 523264   ;;  %vm118_vm4 = vcmask 13312   ;;  %s246_s1 = inlined_call_operand.vmem [shape: f32[64,128], index: 1, kind: input, shape index: {}]   ;;  %s247_s3 = inlined_call_operand.vmem [shape: f32[128,2], index: 3, kind: input, shape index: {}]   ;;  %s248_s2 = inlined_call_operand.vmem [shape: f32[1,128], index: 2, kind: input, shape index: {}]   ;;  %s249_s0 = inlined_call_operand.vmem [shape: f32[6,64], index: 0, kind: input, shape index: {}]   ;;  %s250_s4 = inlined_call_operand.vmem [shape: f32[1,2], index: 4, kind: input, shape index: {}]   ;;  %s251_s5 = inlined_call_operand.vmem [shape: f32[6,2], index: 5, kind: output, shape index: {}]  }
   0x1   :  { %v28_v0 = vld [vmem:[%s246_s1 + $0x38] sm:$0xff]  ;;  %v27_v1 = vld [vmem:[%s246_s1 + $0x30] sm:$0xff]  ;;  %v26_v2 = vld [vmem:[%s246_s1 + $0x28] sm:$0xff] }
   0x2   :  { %45 = vmatpush.msra.mxu0 %v28_v0  ;;  %v73_v3 = vld [vmem:[%s247_s3 + $0x78] sm:$0xff]  ;;  %v72_v4 = vld [vmem:[%s247_s3 + $0x70] sm:$0xff]  ;;  %v25_v5 = vld [vmem:[%s246_s1 + $0x20] sm:$0xff] }
   0x3   :  { %78 = vmatpush.msra.mxu1 %v73_v3  ;;  %v71_v6 = vld [vmem:[%s247_s3 + $0x68] sm:$0xff]  ;;  %v24_v7 = vld [vmem:[%s246_s1 + $0x18] sm:$0xff]  ;;  %v70_v8 = vld [vmem:[%s247_s3 + $0x60] sm:$0xff] }
   0x4   :  { %46 = vmatpush.msra.mxu0 %v27_v1  ;;  %v23_v9 = vld [vmem:[%s246_s1 + $0x10] sm:$0xff]  ;;  %v69_v10 = vld [vmem:[%s247_s3 + $0x58] sm:$0xff]  ;;  %v22_v11 = vld [vmem:[%s246_s1 + $0x8] sm:$0xff] }
   0x5   :  { %79 = vmatpush.msra.mxu1 %v72_v4  ;;  %v68_v12 = vld [vmem:[%s247_s3 + $0x50] sm:$0xff]  ;;  %v21_v13 = vld [vmem:[%s246_s1] sm:$0xff]  ;;  %v67_v15 = vld [vmem:[%s247_s3 + $0x48] sm:$0xff] }
   0x6   :  { %47 = vmatpush.msra.mxu0 %v26_v2  ;;  %v20_v14 = vld [vmem:[%s249_s0] sm:$0x3f]  ;;  %v65_v17 = vld [vmem:[%s247_s3 + $0x38] sm:$0xff]  ;;  %v64_v18 = vld [vmem:[%s247_s3 + $0x30] sm:$0xff] }
   0x7   :  { %80 = vmatpush.msra.mxu1 %v71_v6  ;;  %v66_v16 = vld [vmem:[%s247_s3 + $0x40] sm:$0xff]  ;;  %v63_v19 = vld [vmem:[%s247_s3 + $0x28] sm:$0xff]  ;;  %v61_v21 = vld [vmem:[%s247_s3 + $0x18] sm:$0xff] }
   0x8   :  { %48 = vmatpush.msra.mxu0 %v25_v5  ;;  %v62_v20 = vld [vmem:[%s247_s3 + $0x20] sm:$0xff]  ;;  %v60_v22 = vld [vmem:[%s247_s3 + $0x10] sm:$0xff]  ;;  %v59_v23 = vld [vmem:[%s247_s3 + $0x8] sm:$0xff] }
   0x9   :  { %81 = vmatpush.msra.mxu1 %v70_v8  ;;  %v58_v24 = vld [vmem:[%s247_s3] sm:$0xff] }
   0xa   :  { %49 = vmatpush.msra.mxu0 %v24_v7  ;;  %v126_v25 = vld [vmem:[%s248_s2] ss:$0 sm:$0xff] }
   0xb   :  { %82 = vmatpush.msra.mxu1 %v69_v10  ;;  %v127_v29 = vld [vmem:[%s250_s4] ss:$0 sm:$0xff] }
   0xc   :  { %50 = vmatpush.msra.mxu0 %v23_v9 }
   0xd   :  { %83 = vmatpush.msra.mxu1 %v68_v12 }
   0xe   :  { %51 = vmatpush.msra.mxu0 %v22_v11 }
   0xf   :  { %84 = vmatpush.msra.mxu1 %v67_v15 }
  0x10   :  { %52 = vmatpush.msra.mxu0 %v21_v13 }
  0x11   :  { %124 = vmatmul.msk.f32.vlgmr.msra.gmra.mxu0 %vm33_vm0, %v20_v14  ;;  %85 = vmatpush.msra.mxu1 %v66_v16 }
  0x13   :  { %86 = vmatpush.msra.mxu1 %v65_v17 }
  0x15   :  { %87 = vmatpush.msra.mxu1 %v64_v18 }
  0x17   :  { %88 = vmatpush.msra.mxu1 %v63_v19 }
  0x19   :  { %89 = vmatpush.msra.mxu1 %v62_v20 }
  0x1b   :  { %90 = vmatpush.msra.mxu1 %v61_v21 }
  0x1d   :  { %91 = vmatpush.msra.mxu1 %v60_v22 }
  0x1f   :  { %92 = vmatpush.msra.mxu1 %v59_v23 }
  0x21   :  { %93 = vmatpush.msra.mxu1 %v58_v24 }
  0x8e   :  { %v54_v26 = vpop.f32.mrf.mxu0 }
  0x8f   :  { %v55_v27 = vadd.f32 %v126_v25, %v54_v26 }
  0x91   :  { %v57_v28 = vmax.f32 %v55_v27, 0.0 }
  0x93   :  { %94 = vmatmul.f32.vlgmr.msra.gmra.mxu1 %v57_v28 }
 0x110   :  { %v95_v30 = vpop.f32.mrf.mxu1 }
 0x111   :  { %v96_v31 = vadd.f32 %v127_v29, %v95_v30 }
 0x113   :  { %v98_v32 = vmax.f32 %v96_v31, 0.0 }
 0x115   :  { %v125_v33 = vmul.f32 -1.442695, %v98_v32 }
 0x117   :  { %128 = vpow2.f32 %v125_v33 }
 0x11d   :  { %v129_v34 = vpop.eup %128 }
 0x11e   :  { %v102_v35 = vadd.f32 1.0, %v129_v34 }
 0x120   :  { %130 = vrcp.f32 %v102_v35  ;;  %v114_v39 = vand.u32 2147483648, %v102_v35  ;;  %v112_v41 = vand.u32 2147483647, %v102_v35  ;;  %vm108_vm2 = vweird.f32 %v102_v35 }
 0x122   :  { %v115_v43 = vor.u32 1.1754944e-38, %v114_v39  ;;  %vm113_vm5 = vcmp.eq.f32.partialorder %v112_v41, 8.507059e+37 }
 0x126   :  { %v131_v36 = vpop.eup %130 }
 0x127   :  { %v104_v37 = vmul.f32 %v131_v36, %v102_v35  ;;  %vm109_vm1 = vweird.f32 %v131_v36 }
 0x128   :  { %vm110_vm3 = vmor %vm108_vm2, %vm109_vm1 }
 0x129   :  { %v105_v38 = vsub.f32 1.0, %v104_v37 }
 0x12b   :  { %v106_v40 = vmul.f32 %v131_v36, %v105_v38 }
 0x12d   :  { %v107_v42 = vadd.f32 %v131_v36, %v106_v40 }
 0x12f   :  { %v111_v44 = vsel %vm110_vm3, %v131_v36, %v107_v42 }
 0x130   :  { %v116_v45 = vsel %vm113_vm5, %v115_v43, %v111_v44 }
 0x131   :  { %119 = vst.msk [vmem:[%s251_s5] sm:$0x3f] %vm118_vm4, %v116_v45 }

</bundles_post_ra>
